<compile_context>
chip_gen: v5e
topology: v5e:2x2
jax: 0.10.0
libtpu: 0.0.40
codegen_flags: <defaults>
</compile_context>

<pallas_src>
import math

import jax
import jax.numpy as jnp
from jax.experimental import pallas as pl
from jax.experimental.pallas import tpu as pltpu

_LANE = 128
_SUBLANE = 8


def _round_up(x, m):
    return ((x + m - 1) // m) * m


# ---------------------------------------------------------------------------
# Kernel: acc = u @ Wu + i @ Wi + t @ Wt ; tanh(acc + b) ; L2 normalize
# The branch (item_update vs user_update) is selected purely by which weight
# block the BlockSpec index_map loads -- the body is branch-agnostic.
# ---------------------------------------------------------------------------
def _jodie_rnn_kernel(u_ref, i_ref, t_ref, wu_ref, wi_ref, wt_ref, b_ref, out_ref):
    acc = jnp.dot(u_ref[...], wu_ref[...], preferred_element_type=jnp.float32)
    acc = acc + jnp.dot(i_ref[...], wi_ref[...], preferred_element_type=jnp.float32)
    acc = acc + jnp.dot(t_ref[...], wt_ref[...], preferred_element_type=jnp.float32)
    h_new = jnp.tanh(acc + b_ref[...])                  # f32 epilogue (v5e-safe)
    # F.normalize(h, p=2, dim=1, eps=1e-12) == h * rsqrt(max(sum(h^2), eps^2)).
    # Padded output columns are exactly 0 (zero weight cols + zero bias), so
    # they do not contribute to the norm.
    ss = jnp.sum(h_new * h_new, axis=1, keepdims=True)
    inv = jax.lax.rsqrt(jnp.maximum(ss, 1e-24))         # EUP slot, off the VPU path
    out_ref[...] = (h_new * inv).astype(out_ref.dtype)


def _batch_tiles(B, block_b=1024):
    """Pick batch tile (multiple of 8/16) and grid size; ragged tail is masked."""
    mult = 16 if B >= 16 else _SUBLANE       # 16 keeps bf16 output rows sublane-packed
    b_ceil = _round_up(B, mult)
    if B >= 2 * block_b:
        n = pl.cdiv(B, block_b)
    elif B >= 32:
        n = 2                                # >=2 grid steps -> both v7x TensorCores busy
    else:
        n = 1
    b_tile = min(_round_up(pl.cdiv(b_ceil, n), mult), b_ceil)
    return b_tile, pl.cdiv(B, b_tile)


def _rnn_update(params, user_emb, item_emb, timediffs, features, branches,
                *, block_b=1024, out_dtype=jnp.float32):
    """Run the RNNCell+normalize update for one or both branches in one call.

    branches: (0,) item_update, (1,) user_update, (0, 1) both (fused launch).
    Returns [len(branches), B, H_pad]; padded columns are exactly zero.
    """
    assert timediffs is not None and features is not None
    D = params["embedding_dim"]
    H_pad = params["h_pad"]
    TDP = params["tdft_pad"]
    B = user_emb.shape[0]
    assert user_emb.shape[1] == 2 * D and item_emb.shape[1] == D

    user_emb = user_emb.astype(jnp.float32)
    item_emb = item_emb.astype(jnp.float32)
    # Tiny [B, 1+F] -> [B, TDP] slab (shared by both branches when fused); this is
    # the only wrapper-side materialization and is negligible vs. the old B x 128.
    tdft = jnp.concatenate([timediffs, features], axis=1).astype(jnp.float32)
    if tdft.shape[1] != TDP:
        tdft = jnp.pad(tdft, ((0, 0), (0, TDP - tdft.shape[1])))

    n_br = len(branches)
    br0 = branches[0]                       # branches are contiguous: (0,), (1,), (0,1)
    b_tile, grid_b = _batch_tiles(B, block_b)
    grid = (n_br, grid_b)                   # branch outer -> weights stay VMEM-resident

    def act_spec(cols):
        return pl.BlockSpec((b_tile, cols), lambda br, i: (i, 0))

    def wgt_spec(rows):
        return pl.BlockSpec((None, rows, H_pad), lambda br, i: (br + br0, 0, 0))

    out_bytes = jnp.dtype(out_dtype).itemsize
    bytes_accessed = (n_br * B * (3 * D + TDP) * 4
                      + n_br * (3 * D + TDP + 1) * H_pad * 4
                      + n_br * B * H_pad * out_bytes)
    flops = 2 * n_br * grid_b * b_tile * (3 * D + TDP) * H_pad

    out = pl.pallas_call(
        _jodie_rnn_kernel,
        out_shape=jax.ShapeDtypeStruct((n_br, B, H_pad), out_dtype),
        grid=grid,
        in_specs=[
            act_spec(2 * D),     # user embeddings
            act_spec(D),         # item embeddings
            act_spec(TDP),       # [timediffs | features | zero pad]
            wgt_spec(2 * D),     # weight rows hit by user embeddings
            wgt_spec(D),         # weight rows hit by item embeddings
            wgt_spec(TDP),       # weight rows hit by (timediffs, features)
            wgt_spec(1),         # fused bias (b_ih + b_hh)
        ],
        out_specs=pl.BlockSpec((None, b_tile, H_pad), lambda br, i: (br, i, 0)),
        compiler_params=pltpu.CompilerParams(
            dimension_semantics=("parallel", "parallel")),   # megacore on v7x
        cost_estimate=pl.CostEstimate(
            flops=flops,
            transcendentals=n_br * grid_b * b_tile * (H_pad + 1),  # tanh + rsqrt
            bytes_accessed=bytes_accessed),
    )(user_emb, item_emb, tdft,
      params["w_user"], params["w_item"], params["w_tdft"], params["bias"])
    return out


# ---------------------------------------------------------------------------
# Parameter init (mimics nn.RNNCell default init) + kernel-ready slab layout.
# Branch 0 = item_update (hidden size D), branch 1 = user_update (hidden 2*D).
# ---------------------------------------------------------------------------
def init_jodie_params(key, embedding_dim, num_features):
    D = embedding_dim
    F = num_features
    I = D + 1 + F
    TDP = _round_up(1 + F, _SUBLANE)
    H_pad = _round_up(2 * D, _LANE)

    def rnn_cell_raw(k, input_size, hidden_size):
        stdv = 1.0 / math.sqrt(hidden_size)
        ks = jax.random.split(k, 4)
        return (
            jax.random.uniform(ks[0], (hidden_size, input_size), jnp.float32, -stdv, stdv),
            jax.random.uniform(ks[1], (hidden_size, hidden_size), jnp.float32, -stdv, stdv),
            jax.random.uniform(ks[2], (hidden_size,), jnp.float32, -stdv, stdv),
            jax.random.uniform(ks[3], (hidden_size,), jnp.float32, -stdv, stdv),
        )

    k_item, k_user = jax.random.split(key)
    item_raw = rnn_cell_raw(k_item, I, D)          # RNNCell(D+1+F, D)
    user_raw = rnn_cell_raw(k_user, I, 2 * D)      # RNNCell(D+1+F, 2*D)
    wi_ih, wi_hh, bi_ih, bi_hh = item_raw
    wu_ih, wu_hh, bu_ih, bu_hh = user_raw

    w_user = jnp.zeros((2, 2 * D, H_pad), jnp.float32)   # rows hit by user embeddings
    w_item = jnp.zeros((2, D, H_pad), jnp.float32)       # rows hit by item embeddings
    w_tdft = jnp.zeros((2, TDP, H_pad), jnp.float32)     # rows hit by (td, features)
    bias = jnp.zeros((2, 1, H_pad), jnp.float32)

    # branch 0: item_update.  x = [user[:, :D], td, ft], hidden = item_emb, H = D.
    w_user = w_user.at[0, :D, :D].set(wi_ih[:, :D].T)
    w_item = w_item.at[0, :, :D].set(wi_hh.T)
    w_tdft = w_tdft.at[0, :1 + F, :D].set(wi_ih[:, D:].T)
    bias = bias.at[0, 0, :D].set(bi_ih + bi_hh)

    # branch 1: user_update.  x = [item_emb, td, ft], hidden = user_emb, H = 2*D.
    w_user = w_user.at[1, :, :2 * D].set(wu_hh.T)
    w_item = w_item.at[1, :, :2 * D].set(wu_ih[:, :D].T)
    w_tdft = w_tdft.at[1, :1 + F, :2 * D].set(wu_ih[:, D:].T)
    bias = bias.at[1, 0, :2 * D].set(bu_ih + bu_hh)

    return {
        "embedding_dim": D, "num_features": F,
        "hidden_sizes": (D, 2 * D), "h_pad": H_pad, "tdft_pad": TDP,
        "w_user": w_user, "w_item": w_item, "w_tdft": w_tdft, "bias": bias,
        # raw f32 nn.RNNCell params for reference checking / export
        "item_raw": item_raw, "user_raw": user_raw,
    }


# ---------------------------------------------------------------------------
# JODIE.forward equivalents
# ---------------------------------------------------------------------------
def jodie_forward(params, embedding_dim, user_embeddings, item_embeddings,
                  timediffs=None, features=None, select=None,
                  *, out_dtype=jnp.float32, pad_output=False):
    assert embedding_dim == params["embedding_dim"]
    if select == "item_update":
        br = 0
    elif select == "user_update":
        br = 1
    else:
        raise ValueError(f"unsupported select={select}")
    out = _rnn_update(params, user_embeddings, item_embeddings,
                      timediffs, features, (br,), out_dtype=out_dtype)[0]
    if pad_output:
        return out                                   # [B, H_pad], padded cols are 0
    return out[:, :params["hidden_sizes"][br]]


def jodie_forward_both(params, user_embeddings, item_embeddings, timediffs, features,
                       *, out_dtype=jnp.float32, pad_output=False):
    """Both embedding updates of one JODIE step in a single pallas_call."""
    out = _rnn_update(params, user_embeddings, item_embeddings,
                      timediffs, features, (0, 1), out_dtype=out_dtype)
    item_new, user_new = out[0], out[1]
    if pad_output:
        return item_new, user_new
    return (item_new[:, :params["hidden_sizes"][0]],
            user_new[:, :params["hidden_sizes"][1]])


# Pure-JAX f32 reference for verification
def _reference(params, user_emb, item_emb, td, ft, select):
    D = params["embedding_dim"]
    if select == "item_update":
        w_ih, w_hh, b_ih, b_hh = params["item_raw"]
        x = jnp.concatenate([user_emb[:, :D], td, ft], axis=1)
        h = item_emb
    else:
        w_ih, w_hh, b_ih, b_hh = params["user_raw"]
        x = jnp.concatenate([item_emb, td, ft], axis=1)
        h = user_emb
    h_new = jnp.tanh(x @ w_ih.T + b_ih + h @ w_hh.T + b_hh)
    norm = jnp.sqrt(jnp.sum(h_new * h_new, axis=1, keepdims=True))
    return h_new / jnp.maximum(norm, 1e-12)


if __name__ == "__main__":
    EMBEDDING_DIM = 32
    NUM_FEATURES = 4
    BATCH = 8

    key = jax.random.PRNGKey(0)
    k_params, k_ue, k_ie, k_td, k_ft = jax.random.split(key, 5)
    params = init_jodie_params(k_params, EMBEDDING_DIM, NUM_FEATURES)

    user_embeddings = jax.random.normal(k_ue, (BATCH, 2 * EMBEDDING_DIM), jnp.float32)
    item_embeddings = jax.random.normal(k_ie, (BATCH, EMBEDDING_DIM), jnp.float32)
    timediffs = jax.random.uniform(k_td, (BATCH, 1), jnp.float32)
    features = jax.random.normal(k_ft, (BATCH, NUM_FEATURES), jnp.float32)

    # Single-branch calls (torch forward() semantics).
    item_out = jodie_forward(params, EMBEDDING_DIM, user_embeddings, item_embeddings,
                             timediffs, features, select="item_update")
    user_out = jodie_forward(params, EMBEDDING_DIM, user_embeddings, item_embeddings,
                             timediffs, features, select="user_update")
    # Fused both-branch call (one launch per JODIE step).
    both_item, both_user = jodie_forward_both(params, user_embeddings, item_embeddings,
                                              timediffs, features)
    # bf16-output path (halves output HBM traffic).
    item_bf16 = jodie_forward(params, EMBEDDING_DIM, user_embeddings, item_embeddings,
                              timediffs, features, select="item_update",
                              out_dtype=jnp.bfloat16)
    jax.block_until_ready((item_out, user_out, both_item, both_user, item_bf16))

    ref_item = _reference(params, user_embeddings, item_embeddings,
                          timediffs, features, "item_update")
    ref_user = _reference(params, user_embeddings, item_embeddings,
                          timediffs, features, "user_update")

    assert item_out.shape == (BATCH, EMBEDDING_DIM)
    assert user_out.shape == (BATCH, 2 * EMBEDDING_DIM)
    assert jnp.allclose(item_out, ref_item, atol=1e-2, rtol=1e-2)
    assert jnp.allclose(user_out, ref_user, atol=1e-2, rtol=1e-2)
    assert jnp.allclose(both_item, ref_item, atol=1e-2, rtol=1e-2)
    assert jnp.allclose(both_user, ref_user, atol=1e-2, rtol=1e-2)
    assert jnp.allclose(item_bf16.astype(jnp.float32), ref_item, atol=3e-2, rtol=3e-2)

    print("KERNEL_OK")
</pallas_src>

<mosaic_0001>
module attributes {stable_mosaic.version = 11 : i64} {
  func.func @_jodie_rnn_kernel(%arg0: i32, %arg1: i32, %arg2: memref<8x64xf32, #tpu.memory_space<vmem>>, %arg3: memref<8x32xf32, #tpu.memory_space<vmem>>, %arg4: memref<8x8xf32, #tpu.memory_space<vmem>>, %arg5: memref<1x64x128xf32, #tpu.memory_space<vmem>>, %arg6: memref<1x32x128xf32, #tpu.memory_space<vmem>>, %arg7: memref<1x8x128xf32, #tpu.memory_space<vmem>>, %arg8: memref<1x1x128xf32, #tpu.memory_space<vmem>>, %arg9: memref<1x8x128xf32, #tpu.memory_space<vmem>>) attributes {dimension_semantics = [#tpu.dimension_semantics<parallel>, #tpu.dimension_semantics<parallel>], iteration_bounds = array<i64: 1, 1>, scalar_prefetch = 0 : i64, scratch_operands = 0 : i64, tpu.core_type = #tpu.core_type<tc>, window_params = [{transform_indices = @transform_0, window_bounds = array<i64: 8, 64>}, {transform_indices = @transform_1, window_bounds = array<i64: 8, 32>}, {transform_indices = @transform_2, window_bounds = array<i64: 8, 8>}, {transform_indices = @transform_3, window_bounds = array<i64: 1, 64, 128>}, {transform_indices = @transform_4, window_bounds = array<i64: 1, 32, 128>}, {transform_indices = @transform_5, window_bounds = array<i64: 1, 8, 128>}, {transform_indices = @transform_6, window_bounds = array<i64: 1, 1, 128>}, {transform_indices = @transform_7, window_bounds = array<i64: 1, 8, 128>}]} {
    %c0 = arith.constant 0 : index
    %c0_0 = arith.constant 0 : index
    %0 = vector.load %arg2[%c0, %c0_0] : memref<8x64xf32, #tpu.memory_space<vmem>>, vector<8x64xf32>
    %c0_1 = arith.constant 0 : index
    %c0_2 = arith.constant 0 : index
    %c0_3 = arith.constant 0 : index
    %1 = vector.load %arg5[%c0_1, %c0_2, %c0_3] : memref<1x64x128xf32, #tpu.memory_space<vmem>>, vector<1x64x128xf32>
    %2 = vector.shape_cast %1 : vector<1x64x128xf32> to vector<64x128xf32>
    %cst = arith.constant dense<0.000000e+00> : vector<8x128xf32>
    %3 = tpu.matmul %0, %2, %cst {dimension_numbers = #tpu.dot_dimension_numbers<[1], [0], [0], [1], [0, 0, 1, 1], [], []>} : vector<8x64xf32>, vector<64x128xf32>, vector<8x128xf32> -> vector<8x128xf32>
    %c0_4 = arith.constant 0 : index
    %c0_5 = arith.constant 0 : index
    %4 = vector.load %arg3[%c0_4, %c0_5] : memref<8x32xf32, #tpu.memory_space<vmem>>, vector<8x32xf32>
    %c0_6 = arith.constant 0 : index
    %c0_7 = arith.constant 0 : index
    %c0_8 = arith.constant 0 : index
    %5 = vector.load %arg6[%c0_6, %c0_7, %c0_8] : memref<1x32x128xf32, #tpu.memory_space<vmem>>, vector<1x32x128xf32>
    %6 = vector.shape_cast %5 : vector<1x32x128xf32> to vector<32x128xf32>
    %cst_9 = arith.constant dense<0.000000e+00> : vector<8x128xf32>
    %7 = tpu.matmul %4, %6, %cst_9 {dimension_numbers = #tpu.dot_dimension_numbers<[1], [0], [0], [1], [0, 0, 1, 1], [], []>} : vector<8x32xf32>, vector<32x128xf32>, vector<8x128xf32> -> vector<8x128xf32>
    %8 = arith.addf %3, %7 : vector<8x128xf32>
    %c0_10 = arith.constant 0 : index
    %c0_11 = arith.constant 0 : index
    %9 = vector.load %arg4[%c0_10, %c0_11] : memref<8x8xf32, #tpu.memory_space<vmem>>, vector<8x8xf32>
    %c0_12 = arith.constant 0 : index
    %c0_13 = arith.constant 0 : index
    %c0_14 = arith.constant 0 : index
    %10 = vector.load %arg7[%c0_12, %c0_13, %c0_14] : memref<1x8x128xf32, #tpu.memory_space<vmem>>, vector<1x8x128xf32>
    %11 = vector.shape_cast %10 : vector<1x8x128xf32> to vector<8x128xf32>
    %cst_15 = arith.constant dense<0.000000e+00> : vector<8x128xf32>
    %12 = tpu.matmul %9, %11, %cst_15 {dimension_numbers = #tpu.dot_dimension_numbers<[1], [0], [0], [1], [0, 0, 1, 1], [], []>} : vector<8x8xf32>, vector<8x128xf32>, vector<8x128xf32> -> vector<8x128xf32>
    %13 = arith.addf %8, %12 : vector<8x128xf32>
    %c0_16 = arith.constant 0 : index
    %c0_17 = arith.constant 0 : index
    %c0_18 = arith.constant 0 : index
    %14 = vector.load %arg8[%c0_16, %c0_17, %c0_18] : memref<1x1x128xf32, #tpu.memory_space<vmem>>, vector<1x1x128xf32>
    %15 = vector.shape_cast %14 : vector<1x1x128xf32> to vector<1x128xf32>
    %16 = vector.broadcast %15 : vector<1x128xf32> to vector<8x128xf32>
    %17 = arith.addf %13, %16 : vector<8x128xf32>
    %18 = math.tanh %17 : vector<8x128xf32>
    %19 = arith.mulf %18, %18 : vector<8x128xf32>
    %cst_19 = arith.constant dense<0.000000e+00> : vector<8xf32>
    %20 = vector.multi_reduction <add>, %19, %cst_19 [1] : vector<8x128xf32> to vector<8xf32>
    %21 = vector.shape_cast %20 : vector<8xf32> to vector<8x1xf32>
    %cst_20 = arith.constant 1.000000e-24 : f32
    %22 = vector.broadcast %cst_20 : f32 to vector<8x1xf32>
    %23 = arith.maximumf %21, %22 : vector<8x1xf32>
    %24 = math.rsqrt %23 : vector<8x1xf32>
    %25 = vector.broadcast %24 : vector<8x1xf32> to vector<8x128xf32>
    %26 = arith.mulf %18, %25 : vector<8x128xf32>
    %c0_21 = arith.constant 0 : index
    %c0_22 = arith.constant 0 : index
    %c0_23 = arith.constant 0 : index
    %27 = vector.load %arg9[%c0_21, %c0_22, %c0_23] : memref<1x8x128xf32, #tpu.memory_space<vmem>>, vector<1x8x128xf32>
    %28 = vector.shape_cast %27 : vector<1x8x128xf32> to vector<8x128xf32>
    %29 = vector.shape_cast %26 : vector<8x128xf32> to vector<1x8x128xf32>
    tpu.vector_store %arg9[%c0_21, %c0_22, %c0_23], %29 {strides = array<i32>} : memref<1x8x128xf32, #tpu.memory_space<vmem>>, vector<1x8x128xf32>,
    return
  }
  func.func @transform_0(%arg0: i32, %arg1: i32) -> (i32, i32) {
    %c0_i32 = arith.constant 0 : i32
    %c0_i32_0 = arith.constant 0 : i32
    return %arg1, %c0_i32 : i32, i32
  }
  func.func @transform_1(%arg0: i32, %arg1: i32) -> (i32, i32) {
    %c0_i32 = arith.constant 0 : i32
    %c0_i32_0 = arith.constant 0 : i32
    return %arg1, %c0_i32 : i32, i32
  }
  func.func @transform_2(%arg0: i32, %arg1: i32) -> (i32, i32) {
    %c0_i32 = arith.constant 0 : i32
    %c0_i32_0 = arith.constant 0 : i32
    return %arg1, %c0_i32 : i32, i32
  }
  func.func @transform_3(%arg0: i32, %arg1: i32) -> (i32, i32, i32) {
    %c0_i32 = arith.constant 0 : i32
    %0 = arith.addi %arg0, %c0_i32 : i32
    %c0_i32_0 = arith.constant 0 : i32
    %c0_i32_1 = arith.constant 0 : i32
    %c0_i32_2 = arith.constant 0 : i32
    return %0, %c0_i32_0, %c0_i32_1 : i32, i32, i32
  }
  func.func @transform_4(%arg0: i32, %arg1: i32) -> (i32, i32, i32) {
    %c0_i32 = arith.constant 0 : i32
    %0 = arith.addi %arg0, %c0_i32 : i32
    %c0_i32_0 = arith.constant 0 : i32
    %c0_i32_1 = arith.constant 0 : i32
    %c0_i32_2 = arith.constant 0 : i32
    return %0, %c0_i32_0, %c0_i32_1 : i32, i32, i32
  }
  func.func @transform_5(%arg0: i32, %arg1: i32) -> (i32, i32, i32) {
    %c0_i32 = arith.constant 0 : i32
    %0 = arith.addi %arg0, %c0_i32 : i32
    %c0_i32_0 = arith.constant 0 : i32
    %c0_i32_1 = arith.constant 0 : i32
    %c0_i32_2 = arith.constant 0 : i32
    return %0, %c0_i32_0, %c0_i32_1 : i32, i32, i32
  }
  func.func @transform_6(%arg0: i32, %arg1: i32) -> (i32, i32, i32) {
    %c0_i32 = arith.constant 0 : i32
    %0 = arith.addi %arg0, %c0_i32 : i32
    %c0_i32_0 = arith.constant 0 : i32
    %c0_i32_1 = arith.constant 0 : i32
    %c0_i32_2 = arith.constant 0 : i32
    return %0, %c0_i32_0, %c0_i32_1 : i32, i32, i32
  }
  func.func @transform_7(%arg0: i32, %arg1: i32) -> (i32, i32, i32) {
    %c0_i32 = arith.constant 0 : i32
    %c0_i32_0 = arith.constant 0 : i32
    return %arg0, %arg1, %c0_i32 : i32, i32, i32
  }
}

</mosaic_0001>

<bundles_post_ra>
// kernel: tpu_custom_call.1
= control target key start
LH: loop header
LB: loop body
LE: loop exit
PB: predicated region body
PF: predicated region fallthrough
CT: control target
= control target key end

     0   :  { %12 = vsyncpa [#allocation3], 0  ;;  %s512_s0 = inlined_call_operand.hbm [shape: f32[8,64], index: 0, kind: input, shape index: {}]   ;;  %s513_s1 = inlined_call_operand.hbm [shape: f32[8,32], index: 1, kind: input, shape index: {}]   ;;  %s514_s2 = inlined_call_operand.hbm [shape: f32[8,8], index: 2, kind: input, shape index: {}]   ;;  %s515_s3 = inlined_call_operand.hbm [shape: f32[2,64,128], index: 3, kind: input, shape index: {}]   ;;  %s516_s4 = inlined_call_operand.hbm [shape: f32[2,32,128], index: 4, kind: input, shape index: {}]   ;;  %s517_s5 = inlined_call_operand.hbm [shape: f32[2,8,128], index: 5, kind: input, shape index: {}]   ;;  %s518_s6 = inlined_call_operand.vmem [shape: f32[2,1,128], index: 6, kind: input, shape index: {}]   ;;  %s519_s7 = inlined_call_operand.hbm [shape: f32[1,8,128], index: 7, kind: output, shape index: {}]  }
   0x1   :  { %13 = vsyncpa [#allocation6], 0 }
   0x2   :  { %14 = vsyncpa [#allocation9], 0 }
   0x3   :  { %15 = vsyncpa [#allocation12], 0  ;;  %s33_s26 = sshll.u32 %s513_s1, 4  ;;  %s34_s26 = int_to_ptr.hbm [resolvable:$true] %s33_s26 }
   0x4   :  { %16 = vsyncpa [#allocation4], 0  ;;  %s439_s27 = smov [#allocation5]   ;;  %s54_s8 = sshll.u32 %s515_s3, 4  ;;  %s55_s8 = int_to_ptr.hbm [resolvable:$true] %s54_s8 }
   0x5   :  { %s35_s28 = sshll.u32 %s439_s27, 4  ;;  %s440_s9 = smov [#allocation8]   ;;  %s36_s28 = int_to_ptr.vmem [resolvable:$true] %s35_s28 }
   0x6   :  { %38 = dma.hbm_to_vmem [thread:$0]  %s34_s26, 128, %s36_s28, [#allocation6]  }
   0x7   :  { %s56_s10 = sshll.u32 %s440_s9, 4  ;;  %s441_s11 = smov 128   ;;  %s57_s10 = int_to_ptr.vmem [resolvable:$true] %s56_s10 }
   0x8   :  { %s442_s12 = smov 8   ;;  %s22_s1 = sshll.u32 %s512_s0, 4  ;;  %s23_s1 = int_to_ptr.hbm [resolvable:$true] %s22_s1 }
   0x9   :  { %62 = dma.hbm_to_vmem [thread:$0]  %s55_s8, 1024, %s57_s10, [#allocation9], %s441_s11, %s441_s11, %s442_s12  }
   0xa   :  { %s443_s15 = smov [#allocation2]   ;;  %s44_s3 = sshll.u32 %s514_s2, 4  ;;  %s45_s3 = int_to_ptr.hbm [resolvable:$true] %s44_s3 }
   0xb   :  { %s24_s16 = sshll.u32 %s443_s15, 4  ;;  %s444_s19 = smov [#allocation7]   ;;  %s25_s16 = int_to_ptr.vmem [resolvable:$true] %s24_s16 }
   0xc   :  { %27 = dma.hbm_to_vmem [thread:$0]  %s23_s1, 128, %s25_s16, [#allocation3]  }
   0xd   :  { %s46_s20 = sshll.u32 %s444_s19, 4  ;;  %s67_s23 = sshll.u32 %s516_s4, 4  ;;  %s47_s20 = int_to_ptr.vmem [resolvable:$true] %s46_s20  ;;  %s68_s23 = int_to_ptr.hbm [resolvable:$true] %s67_s23 }
   0xe   :  { %49 = dma.hbm_to_vmem [thread:$0]  %s45_s3, 128, %s47_s20, [#allocation6]  }
   0xf   :  { %s81_s25 = sshll.u32 %s517_s5, 4  ;;  %s445_s26 = smov [#allocation10]   ;;  %s82_s25 = int_to_ptr.hbm [resolvable:$true] %s81_s25 }
  0x10   :  { %s69_s27 = sshll.u32 %s445_s26, 4  ;;  %s446_s2 = smov [#allocation11]   ;;  %s70_s27 = int_to_ptr.vmem [resolvable:$true] %s69_s27 }
  0x11   :  { %75 = dma.hbm_to_vmem [thread:$0]  %s68_s23, 512, %s70_s27, [#allocation9], %s441_s11, %s441_s11, %s442_s12  }
  0x12   :  { %s83_s28 = sshll.u32 %s446_s2, 4  ;;  %s84_s28 = int_to_ptr.vmem [resolvable:$true] %s83_s28 }
  0x13   :  { %86 = dma.hbm_to_vmem [thread:$0]  %s82_s25, 128, %s84_s28, [#allocation12]  }
  0x14   :  { %429 = dma.done.wait [#allocation3], 128  }
  0x15   :  { %430 = vsyncadd [#allocation3], 4294967168 }
  0x16   :  { %431 = dma.done.wait [#allocation6], 256  }
  0x17   :  { %432 = vsyncadd [#allocation6], 4294967040 }
  0x18   :  { %433 = dma.done.wait [#allocation9], 1536  }
  0x19   :  { %434 = vsyncadd [#allocation9], 4294965760 }
  0x1a   :  { %435 = dma.done.wait [#allocation12], 128  }
  0x1b   :  { %436 = vsyncadd [#allocation12], 4294967168  ;;  %v121_v0 = vld [vmem:[#allocation8 + $0x38] sm:$0xff]  ;;  %v120_v1 = vld [vmem:[#allocation8 + $0x30] sm:$0xff]  ;;  %vm177_vm0 = vcmask 64512   ;;  %vm127_vm1 = vcmask 261120  }
  0x1c   :  { %163 = vmatpush.msra.mxu1 %v121_v0  ;;  %v126_v2 = vld [vmem:[#allocation10 + $0x18] sm:$0xff]  ;;  %v119_v3 = vld [vmem:[#allocation8 + $0x28] sm:$0xff]  ;;  %v125_v4 = vld [vmem:[#allocation10 + $0x10] sm:$0xff]  ;;  %vm151_vm2 = vcmask 523264   ;;  %s447_s29 = smov [#allocation13]   ;;  %s231_s9 = sshll.u32 %s519_s7, 4  ;;  %s232_s9 = int_to_ptr.hbm [resolvable:$true] %s231_s9 }
  0x1d   :  { %143 = vmatpush.msra.mxu0 %v126_v2  ;;  %v176_v5 = vld [vmem:[#allocation11] sm:$0xff]  ;;  %v175_v6 = vld [vmem:[#allocation7] sm:$0xff]  ;;  %v124_v7 = vld [vmem:[#allocation10 + $0x8] sm:$0xff]  ;;  %s229_s30 = sshll.u32 %s447_s29, 4  ;;  %s230_s30 = int_to_ptr.vmem [resolvable:$true] %s229_s30 }
  0x1e   :  { %164 = vmatpush.msra.mxu1 %v120_v1  ;;  %196 = vmatpush.msra.mxu2 %v176_v5  ;;  %v118_v8 = vld [vmem:[#allocation8 + $0x20] sm:$0xff]  ;;  %v117_v10 = vld [vmem:[#allocation8 + $0x18] sm:$0xff]  ;;  %v122_v11 = vld [vmem:[#allocation5] sm:$0xff] }
  0x1f   :  { %144 = vmatpush.msra.mxu0 %v125_v4  ;;  %246 = vmatmul.msk.f32.vlgmr.msra.gmra.mxu2 %vm177_vm0, %v175_v6  ;;  %v123_v9 = vld [vmem:[#allocation10] sm:$0xff]  ;;  %v116_v12 = vld [vmem:[#allocation8 + $0x10] sm:$0xff]  ;;  %v115_v13 = vld [vmem:[#allocation8 + $0x8] sm:$0xff] }
  0x20   :  { %165 = vmatpush.msra.mxu1 %v119_v3  ;;  %v114_v14 = vld [vmem:[#allocation8] sm:$0xff]  ;;  %v113_v15 = vld [vmem:[#allocation2] sm:$0xff] }
  0x21   :  { %145 = vmatpush.msra.mxu0 %v124_v7  ;;  %v256_v20 = vld [vmem:[%s518_s6] ss:$0 sm:$0xff] }
  0x22   :  { %166 = vmatpush.msra.mxu1 %v118_v8 }
  0x23   :  { %146 = vmatpush.msra.mxu0 %v123_v9 }
  0x24   :  { %167 = vmatpush.msra.mxu1 %v117_v10  ;;  %244 = vmatmul.msk.f32.vlgmr.msra.gmra.mxu0 %vm127_vm1, %v122_v11 }
  0x26   :  { %168 = vmatpush.msra.mxu1 %v116_v12 }
  0x28   :  { %169 = vmatpush.msra.mxu1 %v115_v13 }
  0x2a   :  { %170 = vmatpush.msra.mxu1 %v114_v14 }
  0x2b   :  { %245 = vmatmul.msk.f32.vlgmr.msra.gmra.mxu1 %vm151_vm2, %v113_v15 }
  0xa1   :  { %v148_v16 = vpop.f32.mrf.mxu0 }
  0xa2   :  { %v198_v18 = vpop.f32.mrf.mxu2 }
  0xa8   :  { %v172_v17 = vpop.f32.mrf.mxu1 }
  0xa9   :  { %v173_v19 = vadd.f32 %v172_v17, %v148_v16 }
  0xab   :  { %v201_v21 = vadd.f32 %v198_v18, %v173_v19 }
  0xad   :  { %v206_v22 = vadd.f32 %v256_v20, %v201_v21 }
  0xaf   :  { %257 = vtanh.f32 %v206_v22 }
  0xb5   :  { %v258_v23 = vpop.eup %257 }
  0xb6   :  { %v208_v24 = vmul.f32 %v258_v23, %v258_v23 }
  0xb8   :  { %209 = vadd.xlane.f32.xlu0 %v208_v24 }
 0x12b   :  { %v210_v25 = vpop.xlane.xlu0 %209 }
 0x12c   :  { %v211_v26 = vmax.f32 %v210_v25, 1e-24 }
 0x12e   :  { %259 = vrsqrt.f32 %v211_v26  ;;  %vm218_vm4 = vweird.f32 %v211_v26 }
 0x134   :  { %v260_v27 = vpop.eup %259 }
 0x135   :  { %v213_v28 = vmul.f32 %v260_v27, %v211_v26  ;;  %vm219_vm3 = vweird.f32 %v260_v27 }
 0x136   :  { %vm220_vm5 = vmor %vm218_vm4, %vm219_vm3 }
 0x137   :  { %v214_v29 = vmul.f32 %v260_v27, %v213_v28 }
 0x139   :  { %v215_v30 = vmul.f32 0.5, %v214_v29 }
 0x13b   :  { %v216_v31 = vsub.f32 1.5, %v215_v30 }
 0x13d   :  { %v217_v32 = vmul.f32 %v260_v27, %v216_v31 }
 0x13f   :  { %v221_v33 = vsel %vm220_vm5, %v260_v27, %v217_v32 }
 0x140   :  { %v222_v34 = vmul.f32 %v258_v23, %v221_v33 }
 0x142   :  { %223 = vst [vmem:[#allocation13] sm:$0xff] %v222_v34 }
 0x143   :  { %234 = dma.vmem_to_hbm [thread:$0]  %s230_s30, 128, %s232_s9, [#allocation4]  }
 0x144   :  { %437 = dma.done.wait [#allocation4], 128  }
 0x145   :  { %438 = vsyncadd [#allocation4], 4294967168 }
 0x146   :  { %239 = vsyncpa [#allocation3], 1 }
 0x147   :  { %240 = vsyncpa [#allocation6], 1 }
 0x148   :  { %241 = vsyncpa [#allocation9], 1 }
 0x149   :  { %242 = vsyncpa [#allocation12], 1 }
 0x14a   :  { %243 = vsyncpa [#allocation4], 1 }

</bundles_post_ra>
